<compile_context>
chip_gen: v7x
topology: tpu7x:2x2x1
jax: 0.10.0
libtpu: 0.0.40
codegen_flags: <defaults>
</compile_context>

<pallas_src>
import jax
import jax.numpy as jnp
from jax.experimental import pallas as pl
from jax.experimental.pallas import tpu as pltpu

_MIB = 1024 * 1024
_BLOCK_TARGET_BYTES = 4 * _MIB  # padded-VMEM bytes per pipeline buffer


def _round_up(x, m):
    return (x + m - 1) // m * m


def _sublane_tile(dtype):
    # Native second-minor tiling: 8 for 32-bit, 16 for 16-bit, 32 for 8-bit.
    itemsize = jnp.dtype(dtype).itemsize
    return 8 * max(1, 4 // itemsize)


def _vmem_limit_bytes(block_bytes):
    # 2 operands (in + out) x double buffering + headroom; raise above v5e's
    # 16 MiB scoped default, stay below physical VMEM (v7x has only 64 MiB).
    try:
        phys = int(pltpu.get_tpu_info().vmem_capacity_bytes)
    except Exception:
        phys = 64 * _MIB
    want = max(32 * _MIB, 4 * block_bytes + 8 * _MIB)
    return min(want, max(32 * _MIB, phys - 8 * _MIB))


def _symsum_halves_kernel(x_ref, o_ref):
    # Block (nb, 2, C//2, L).  roll(neg, C//2, channel) == swap channel halves,
    # so the whole op is elementwise once the halves sit on an untiled axis:
    # no relayout, no XLU work, single read of x.
    x = x_ref[...]
    zero = jnp.zeros((), x.dtype)
    lo = x[:, 0:1, :, :]
    hi = x[:, 1:2, :, :]
    o_ref[:, 0:1, :, :] = jnp.maximum(zero, lo) + jnp.minimum(zero, hi)
    o_ref[:, 1:2, :, :] = jnp.maximum(zero, hi) + jnp.minimum(zero, lo)


def _symsum_roll_kernel(x_ref, o_ref):
    # Odd-C fallback.  Block (C, L).  rolled[i] = neg[(i - shift) mod C].
    x = x_ref[...]
    c = x.shape[0]
    shift = c // 2
    zero = jnp.zeros((), x.dtype)
    relu = jnp.maximum(zero, x)
    neg = jnp.minimum(zero, x)
    if shift == 0:
        rolled = neg
    else:
        rolled = jnp.concatenate([neg[c - shift:, :], neg[: c - shift, :]], axis=0)
    o_ref[...] = relu + rolled


def _symsum_even(x_nchw, block_target):
    n, c, h, w = x_nchw.shape
    hw = h * w
    c2 = c // 2
    dtype = x_nchw.dtype
    itemsize = jnp.dtype(dtype).itemsize
    st = _sublane_tile(dtype)

    x4 = x_nchw.reshape(n, 2, c2, hw)  # free view, fully contiguous in HBM

    # Layout-padded VMEM footprint of one sample's (2, C//2, HW) slab.
    padded_sample = 2 * _round_up(c2, st) * _round_up(hw, 128) * itemsize

    if padded_sample <= block_target:
        # N-blocking: contiguous (n_block, 2, C//2, HW) slabs -> one linear DMA.
        n_block = max(1, min(block_target // padded_sample, n))
        if n >= 2:
            # Keep >= 2 grid blocks so v7x's two TensorCores both get work.
            n_block = min(n_block, -(-n // 2))
        grid = (pl.cdiv(n, n_block),)
        block = (n_block, 2, c2, hw)
        in_spec = pl.BlockSpec(block, lambda i: (i, 0, 0, 0))
        out_spec = pl.BlockSpec(block, lambda i: (i, 0, 0, 0))
        dim_sem = ("parallel",)
        block_bytes = n_block * padded_sample
    else:
        # Large samples: tile HW with lane-dense (multiple-of-128) tiles.
        bytes_per_128 = 2 * _round_up(c2, st) * 128 * itemsize
        tile_hw = max(128, (block_target // bytes_per_128) * 128)
        tile_hw = min(tile_hw, _round_up(hw, 128))
        grid = (n, pl.cdiv(hw, tile_hw))
        block = (1, 2, c2, tile_hw)
        in_spec = pl.BlockSpec(block, lambda i, j: (i, 0, 0, j))
        out_spec = pl.BlockSpec(block, lambda i, j: (i, 0, 0, j))
        dim_sem = ("parallel", "parallel")
        block_bytes = 2 * _round_up(c2, st) * tile_hw * itemsize

    out4 = pl.pallas_call(
        _symsum_halves_kernel,
        out_shape=jax.ShapeDtypeStruct((n, 2, c2, hw), dtype),
        grid_spec=pltpu.PrefetchScalarGridSpec(
            num_scalar_prefetch=0,
            grid=grid,
            in_specs=[in_spec],
            out_specs=out_spec,
        ),
        compiler_params=pltpu.CompilerParams(
            dimension_semantics=dim_sem,
            vmem_limit_bytes=_vmem_limit_bytes(block_bytes),
        ),
        cost_estimate=pl.CostEstimate(
            flops=3 * n * c * hw,
            bytes_accessed=2 * n * c * hw * itemsize,
            transcendentals=0,
        ),
    )(x4)
    return out4.reshape(n, c, h, w)


def _symsum_odd(x_nchw, block_target):
    # Rare odd-C fallback: per-sample (C, tile_hw) blocks, concat roll along
    # the sublane axis inside the kernel (hidden under the HBM bound).
    n, c, h, w = x_nchw.shape
    hw = h * w
    dtype = x_nchw.dtype
    itemsize = jnp.dtype(dtype).itemsize
    st = _sublane_tile(dtype)

    x3 = x_nchw.reshape(n, c, hw)

    bytes_per_128 = _round_up(c, st) * 128 * itemsize
    tile_hw = max(128, (block_target // bytes_per_128) * 128)
    tile_hw = min(tile_hw, _round_up(hw, 128))
    grid = (n, pl.cdiv(hw, tile_hw))
    block = (None, c, tile_hw)  # leading N dim squeezed out of the kernel
    block_bytes = _round_up(c, st) * tile_hw * itemsize

    out3 = pl.pallas_call(
        _symsum_roll_kernel,
        out_shape=jax.ShapeDtypeStruct((n, c, hw), dtype),
        grid_spec=pltpu.PrefetchScalarGridSpec(
            num_scalar_prefetch=0,
            grid=grid,
            in_specs=[pl.BlockSpec(block, lambda i, j: (i, 0, j))],
            out_specs=pl.BlockSpec(block, lambda i, j: (i, 0, j)),
        ),
        compiler_params=pltpu.CompilerParams(
            dimension_semantics=("parallel", "parallel"),
            vmem_limit_bytes=_vmem_limit_bytes(block_bytes),
        ),
        cost_estimate=pl.CostEstimate(
            flops=3 * n * c * hw,
            bytes_accessed=2 * n * c * hw * itemsize,
            transcendentals=0,
        ),
    )(x3)
    return out3.reshape(n, c, h, w)


def symsum(x_nchw, *, block_target_bytes=_BLOCK_TARGET_BYTES):
    """SymSum forward.  x_nchw: (N, C, H, W) array.

    out[n, c] = max(0, x[n, c]) + min(0, x[n, (c - C//2) mod C])
    """
    if x_nchw.ndim != 4:
        raise ValueError("expected NCHW input")
    if x_nchw.size == 0:
        return x_nchw
    # NOTE: for extreme channel counts (C * 128 lanes * itemsize >> 8 MiB,
    # i.e. C >= ~16K fp32) a single minimum-width block would exceed the v7x
    # VMEM budget; such shapes are not expected for SymSum.
    if x_nchw.shape[1] % 2 == 0:
        return _symsum_even(x_nchw, block_target_bytes)
    return _symsum_odd(x_nchw, block_target_bytes)


def _symsum_ref(x_nchw):
    c = x_nchw.shape[1]
    shift = c // 2
    relu = jnp.maximum(0.0, x_nchw)
    inv_relu = jnp.minimum(0.0, x_nchw)
    return jnp.roll(inv_relu, shift, axis=1) + relu


if __name__ == "__main__":
    key = jax.random.PRNGKey(0)
    cases = [
        # (shape, dtype, kwargs)
        ((2, 4, 16, 16), jnp.float32, {}),                  # even C, N-blocked fast path
        ((2, 16, 8, 8), jnp.bfloat16, {}),                  # even C, 16-bit dtype
        ((2, 8, 14, 14), jnp.float32,
         dict(block_target_bytes=4096)),                    # even C, HW-tiled + masked edge block
        ((2, 5, 8, 8), jnp.float32, {}),                    # odd C concat-roll fallback
    ]
    for shape, dtype, kwargs in cases:
        key, sub = jax.random.split(key)
        x = jax.random.normal(sub, shape, dtype=jnp.float32).astype(dtype)
        out = symsum(x, **kwargs)
        jax.block_until_ready(out)
        ref = _symsum_ref(x)
        assert out.shape == x.shape and out.dtype == x.dtype, shape
        assert jnp.allclose(out.astype(jnp.float32), ref.astype(jnp.float32),
                            atol=1e-5, rtol=1e-5), shape
    print("KERNEL_OK")
</pallas_src>

<mosaic_0001>
module attributes {stable_mosaic.version = 11 : i64} {
  func.func @_symsum_halves_kernel(%arg0: i32, %arg1: memref<1x2x2x256xf32, #tpu.memory_space<vmem>>, %arg2: memref<1x2x2x256xf32, #tpu.memory_space<vmem>>) attributes {dimension_semantics = [#tpu.dimension_semantics<parallel>], iteration_bounds = array<i64: 2>, scalar_prefetch = 0 : i64, scratch_operands = 0 : i64, tpu.core_type = #tpu.core_type<tc>, window_params = [{transform_indices = @transform_0, window_bounds = array<i64: 1, 2, 2, 256>}, {transform_indices = @transform_1, window_bounds = array<i64: 1, 2, 2, 256>}]} {
    %c0 = arith.constant 0 : index
    %c0_0 = arith.constant 0 : index
    %c0_1 = arith.constant 0 : index
    %c0_2 = arith.constant 0 : index
    %0 = vector.load %arg1[%c0, %c0_0, %c0_1, %c0_2] : memref<1x2x2x256xf32, #tpu.memory_space<vmem>>, vector<1x2x2x256xf32>
    %1 = vector.extract_strided_slice %0 {offsets = [0, 0, 0, 0], sizes = [1, 1, 2, 256], strides = [1, 1, 1, 1]} : vector<1x2x2x256xf32> to vector<1x1x2x256xf32>
    %2 = vector.extract_strided_slice %0 {offsets = [0, 1, 0, 0], sizes = [1, 1, 2, 256], strides = [1, 1, 1, 1]} : vector<1x2x2x256xf32> to vector<1x1x2x256xf32>
    %cst = arith.constant 0.000000e+00 : f32
    %3 = vector.broadcast %cst : f32 to vector<1x1x2x256xf32>
    %4 = arith.maximumf %3, %1 : vector<1x1x2x256xf32>
    %cst_3 = arith.constant 0.000000e+00 : f32
    %5 = vector.broadcast %cst_3 : f32 to vector<1x1x2x256xf32>
    %6 = arith.minimumf %5, %2 : vector<1x1x2x256xf32>
    %7 = arith.addf %4, %6 : vector<1x1x2x256xf32>
    %c0_4 = arith.constant 0 : index
    %c0_5 = arith.constant 0 : index
    %c0_6 = arith.constant 0 : index
    %c0_7 = arith.constant 0 : index
    %8 = vector.load %arg2[%c0_4, %c0_5, %c0_6, %c0_7] : memref<1x2x2x256xf32, #tpu.memory_space<vmem>>, vector<1x1x2x256xf32>
    tpu.vector_store %arg2[%c0_4, %c0_5, %c0_6, %c0_7], %7 {strides = array<i32>} : memref<1x2x2x256xf32, #tpu.memory_space<vmem>>, vector<1x1x2x256xf32>,
    %cst_8 = arith.constant 0.000000e+00 : f32
    %9 = vector.broadcast %cst_8 : f32 to vector<1x1x2x256xf32>
    %10 = arith.maximumf %9, %2 : vector<1x1x2x256xf32>
    %cst_9 = arith.constant 0.000000e+00 : f32
    %11 = vector.broadcast %cst_9 : f32 to vector<1x1x2x256xf32>
    %12 = arith.minimumf %11, %1 : vector<1x1x2x256xf32>
    %13 = arith.addf %10, %12 : vector<1x1x2x256xf32>
    %c0_10 = arith.constant 0 : index
    %c1 = arith.constant 1 : index
    %c0_11 = arith.constant 0 : index
    %c0_12 = arith.constant 0 : index
    %14 = vector.load %arg2[%c0_10, %c1, %c0_11, %c0_12] : memref<1x2x2x256xf32, #tpu.memory_space<vmem>>, vector<1x1x2x256xf32>
    tpu.vector_store %arg2[%c0_10, %c1, %c0_11, %c0_12], %13 {strides = array<i32>} : memref<1x2x2x256xf32, #tpu.memory_space<vmem>>, vector<1x1x2x256xf32>,
    return
  }
  func.func @transform_0(%arg0: i32) -> (i32, i32, i32, i32) {
    %c0_i32 = arith.constant 0 : i32
    %c0_i32_0 = arith.constant 0 : i32
    %c0_i32_1 = arith.constant 0 : i32
    %c0_i32_2 = arith.constant 0 : i32
    return %arg0, %c0_i32, %c0_i32_0, %c0_i32_1 : i32, i32, i32, i32
  }
  func.func @transform_1(%arg0: i32) -> (i32, i32, i32, i32) {
    %c0_i32 = arith.constant 0 : i32
    %c0_i32_0 = arith.constant 0 : i32
    %c0_i32_1 = arith.constant 0 : i32
    %c0_i32_2 = arith.constant 0 : i32
    return %arg0, %c0_i32, %c0_i32_0, %c0_i32_1 : i32, i32, i32, i32
  }
}

</mosaic_0001>

<bundles_post_ra>
// kernel: tpu_custom_call.1
= control target key start
LH: loop header
LB: loop body
LE: loop exit
PB: predicated region body
PF: predicated region fallthrough
CT: control target
= control target key end

     0   :  { %6 = vsyncpa [#allocation3], 0  ;;  %s576_s0 = inlined_call_operand.hbm [shape: f32[2,2,2,256], index: 0, kind: input, shape index: {}]   ;;  %s577_s1 = inlined_call_operand.hbm [shape: f32[2,2,2,256], index: 1, kind: output, shape index: {}]  }
   0x1   :  { %8 = vsyncpa [#allocation3 + $0x1], 0 }
   0x2   :  { %9 = vsyncpa [#allocation4], 0 }
   0x3   :  { %11 = vsyncpa [#allocation4 + $0x1], 0  ;;  %s414_s6 = smov 0   ;;  %s416_s7 = smov 0  }
   0x4   :  { %s418_s8 = smov 0   ;;  %s420_s9 = smov 0  }
   0x5 LB: > { %s435_s10 = sadd.s32 4294967295, %s396_s9   ;;  %s233_s11 = sadd.s32 4294967294, %s396_s9   ;;  %s396_s9 = sphi %s420_s9, %s590_s9   ;;  %s392_s8 = sphi %s418_s8, %s589_s8   ;;  %s388_s7 = sphi %s416_s7, %s588_s7   ;;  %s384_s6 = sphi %s414_s6, %s587_s6  }
   0x6   : > { %s439_s12 = sadd.s32 1, %s396_s9   ;;  %s24_s13 = sadd.s32 1, %s392_s8 }
   0x7   : > { %s21_s14 = ssub.s32 %s396_s9, %s439_s12  ;;  %p31_p0 = scmp.ne.s32.totalorder %s392_s8, %s388_s7 }
   0x8   : > { %p22_p1 = scmp.eq.s32.totalorder %s21_s14, 0  ;;  %p32_p2 = scmp.eq.s32.totalorder %s396_s9, 0 }
   0x9   : > { %p37_p3 = scmp.ne.s32.totalorder %s388_s7, %s384_s6  ;;  %p38_p4 = scmp.eq.s32.totalorder %s435_s10, 0 }
   0xa   : > { %s451_s15 = scalar_select %p22_p1, %s392_s8, %s24_s13  }
   0xb   : > { %p453_p5 = por %p32_p2, %p31_p0  ;;  %p457_p6 = por %p38_p4, %p37_p3 }
   0xc   : > { %p61_p7 = scmp.eq.s32.totalorder %s435_s10, 1  ;;  %p67_p8 = scmp.eq.s32.totalorder %s233_s11, 1 }
   0xd   : > { %p262_p10 = scmp.lt.s32.totalorder %s396_s9, 2  ;;  %s87_s20 = sand.u32 1, %s392_s8  }
   0xe   : > { %p464_p11 = por %p61_p7, %p31_p0  ;;  %p468_p12 = por %p67_p8, %p37_p3 }
   0xf   : > { %s248_s21 = sshll.u32 %s396_s9, 7  ;;  %s236_s22 = sshll.u32 %s87_s20, 3 }
  0x10   : > { %s581_s18 = scalar_select %p464_p11, 1, 0 }
  0x11   : > { %s582_s19 = scalar_select %p468_p12, 1, 0 }
  0x12   : > { %s477_s25 = scalar_lea.hbm %s576_s0, %s248_s21  ;;  %s91_s26 = scalar_lea.vmem [#allocation2], %s236_s22 }
  0x13   : > { %s98_s27 = sshll.u32 %s91_s26, 4  ;;  %p481_p13 = pnand %p262_p10, %p453_p5  ;;  %s485_s27 = int_to_ptr.vmem [resolvable:$true] %s98_s27 }
  0x14   : > { %s487_s29 = scalar_lea.sflag [#allocation3], %s87_s20  ;;  %s300_s30 = scalar_lea.hbm %s477_s25, 128 }
  0x15   : > { %p301_p0 = scmp.ne.s32.totalorder %s477_s25, %s300_s30  ;;  %p302_p1 = pneg %p481_p13 }
  0x16   : > { %s305_s4 = scalar_lea.hbm %s576_s0, 256  ;;  %p306_p4 = scmp.lt.u32.totalorder %s477_s25, %s576_s0 }
  0x17   : > { %p303_p2 = pnand %p302_p1, %p301_p0  ;;  %p307_p5 = scmp.lt.u32.totalorder %s305_s4, %s300_s30 }
  0x18   : > { %p309_p8 = scmp.lt.u32.totalorder %s300_s30, %s477_s25 }
  0x19   : > { %p304_p3 = pneg %p303_p2  ;;  %p308_p7 = por %p307_p5, %p306_p4 }
  0x1b   : > { %p310_p10 = por %p309_p8, %p308_p7 }
  0x1d   : > { %p311_p9 = pnand %p310_p10, %p304_p3 }
  0x1f   : > { %314 = shalt.err (!%p311_p9)
}
  0x20   : > { %s315_s13 = scalar_lea.vmem %s485_s27, 128  ;;  %s398_s14 = smov [#allocation2]  }
  0x21   : > { %p316_p0 = scmp.ne.s32.totalorder %s485_s27, %s315_s13  ;;  %s320_s16 = sshll.u32 %s398_s14, 4  ;;  %s321_s16 = int_to_ptr.vmem [resolvable:$false] %s320_s16 }
  0x22   : > { %s322_s20 = scalar_lea.vmem %s321_s16, 256  ;;  %p323_p11 = scmp.lt.s32.totalorder %s485_s27, %s321_s16 }
  0x23   : > { %p318_p2 = pnand %p316_p0, %p302_p1  ;;  %p324_p4 = scmp.lt.s32.totalorder %s322_s20, %s315_s13 }
  0x25   : > { %p319_p12 = pneg %p318_p2  ;;  %p325_p5 = por %p324_p4, %p323_p11 }
  0x27   : > { %p326_p7 = pnand %p325_p5, %p319_p12 }
  0x29   : > { %329 = shalt.err (!%p326_p7)
}
  0x2a   : > { %s399_s21 = smov 64   ;;  %s400_s22 = smov 4  }
  0x2b   : > { %257 = dma.hbm_to_vmem [thread:$0]  (!%p481_p13), %s477_s25, 128, %s485_s27, %s487_s29, %s399_s21, %s399_s21, %s400_s22  }
  0x2c   : > { %p239_p9 = scmp.ge.s32.totalorder %s396_s9, 1  ;;  %p106_p1 = scmp.lt.s32.totalorder %s396_s9, 3 }
  0x2e   : > { %p107_p3 = pnand %p239_p9, %p106_p1 }
  0x2f   : > { %s518_s23 = sand.u32 (!%p107_p3), 1, %s388_s7  }
  0x30   : > { %110 = sbr.rel (%p107_p3) target bundleno = 83 (0x53), region = 24  ;;  %s240_s24 = sshll.u32 (!%p107_p3), %s518_s23, 3 }
  0x31   : > { %s113_s26 = scalar_lea.sflag (!%p107_p3), [#allocation3], %s518_s23  ;;  %s116_s30 = scalar_lea.vmem (!%p107_p3), [#allocation2], %s240_s24 }
  0x37   : > { %375 = dma.done.wait (%p457_p6), %s113_s26, 128  }
  0x38   : > { %377 = vsyncadd (%p457_p6), %s113_s26, 4294967168  ;;  %s134_s25 = scalar_lea.vmem [#allocation5], %s240_s24  ;;  %s249_s28 = sshll.u32 %s435_s10, 7  ;;  %v135_v0 = vld [vmem:[%s116_s30] sm:$0xf] }
  0x39   : > { %s160_s27 = sshll.u32 %s134_s25, 4  ;;  %v136_v1 = vld [vmem:[%s116_s30 + $0x4] sm:$0xf]  ;;  %v137_v2 = vmax.f32 %v135_v0, 0.0  ;;  %v142_v5 = vmin.f32 %v135_v0, 0.0  ;;  %s532_s17 = scalar_lea.hbm %s577_s1, %s249_s28  ;;  %s527_s27 = int_to_ptr.vmem [resolvable:$true] %s160_s27 }
  0x3a   : > { %v138_v3 = vmin.f32 %v136_v1, 0.0  ;;  %v141_v4 = vmax.f32 %v136_v1, 0.0  ;;  %s147_s10 = scalar_lea.sflag [#allocation4], %s518_s23  ;;  %s330_s3 = scalar_lea.vmem %s527_s27, 128 }
  0x3b   : > { %p331_p6 = scmp.ne.s32.totalorder %s527_s27, %s330_s3  ;;  %p584_p11 = scmp.ne.s32.totalorder %s581_s18, 0 }
  0x3c   : > { %v139_v6 = vadd.f32 %v138_v3, %v137_v2  ;;  %v143_v7 = vadd.f32 %v142_v5, %v141_v4  ;;  %s401_s4 = smov [#allocation5]  }
  0x3d   : > { %p332_p12 = pnand %p331_p6, %p584_p11  ;;  %s334_s5 = sshll.u32 %s401_s4, 4  ;;  %s335_s5 = int_to_ptr.vmem [resolvable:$false] %s334_s5 }
  0x3e   : > { %140 = vst [vmem:[%s134_s25] sm:$0xf] %v139_v6  ;;  %242 = vst [vmem:[%s134_s25 + $0x4] sm:$0xf] %v143_v7  ;;  %s336_s11 = scalar_lea.vmem %s335_s5, 256  ;;  %p337_p8 = scmp.lt.s32.totalorder %s527_s27, %s335_s5 }
  0x3f   : > { %p333_p13 = pneg %p332_p12  ;;  %p338_p10 = scmp.lt.s32.totalorder %s336_s11, %s330_s3 }
  0x41   : > { %p339_p0 = por %p338_p10, %p337_p8 }
  0x43   : > { %p340_p2 = pnand %p339_p0, %p333_p13 }
  0x45   : > { %343 = shalt.err (!%p340_p2)
}
  0x46   : > { %s344_s13 = scalar_lea.hbm %s532_s17, 128  ;;  %s348_s20 = scalar_lea.hbm %s577_s1, 256 }
  0x47   : > { %p345_p4 = scmp.ne.s32.totalorder %s532_s17, %s344_s13  ;;  %p349_p9 = scmp.lt.u32.totalorder %s532_s17, %s577_s1 }
  0x48   : > { %p350_p1 = scmp.lt.u32.totalorder %s348_s20, %s344_s13  ;;  %p352_p6 = scmp.lt.u32.totalorder %s344_s13, %s532_s17 }
  0x49   : > { %p346_p5 = pnand %p345_p4, %p584_p11 }
  0x4a   : > { %p351_p3 = por %p350_p1, %p349_p9 }
  0x4b   : > { %p347_p7 = pneg %p346_p5 }
  0x4c   : > { %p353_p12 = por %p352_p6, %p351_p3 }
  0x4e   : > { %p354_p13 = pnand %p353_p12, %p347_p7 }
  0x50   : > { %357 = shalt.err (!%p354_p13)
}
  0x51   : > { %s402_s24 = smov 64   ;;  %s403_s26 = smov 4  }
  0x52   : > { %252 = dma.vmem_to_hbm [thread:$0]  (%p584_p11), %s527_s27, 128, %s532_s17, %s147_s10, %s402_s24, %s402_s24, %s403_s26  }
  0x53 PF: > { %s175_s30 = sand.u32 1, %s384_s6   ;;  %p585_p8 = scmp.ne.s32.totalorder %s582_s19, 0 }
  0x54   : > { %p586_p10 = scmp.ge.s32.totalorder %s396_s9, 2  ;;  %s176_s25 = scalar_lea.sflag [#allocation4], %s175_s30 }
  0x56   : > { %p259_p0 = pnand %p586_p10, %p585_p8 }
  0x58   : > { %379 = dma.done.wait (!%p259_p0), %s176_s25, 128  }
  0x59   : > { %381 = vsyncadd (!%p259_p0), %s176_s25, 4294967168  ;;  %p14_p2 = scmp.ge.s32.totalorder %s439_s12, 4   ;;  %s587_s6 = smov %s388_s7 }
  0x5a   : > { %s588_s7 = smov %s392_s8  ;;  %s589_s8 = smov %s451_s15 }
  0x5b   : > { %s590_s9 = smov %s439_s12  ;;  %16 = sbr.rel (!%p14_p2) target bundleno = 5 (0x5), region = 70 }
  0x62   :  { %181 = vsyncpa [#allocation3], 1 }
  0x63   :  { %183 = vsyncpa [#allocation3 + $0x1], 1 }
  0x64   :  { %184 = vsyncpa [#allocation4], 1 }
  0x65   :  { %186 = vsyncpa [#allocation4 + $0x1], 1 }

</bundles_post_ra>
